<compile_context>
chip_gen: v7x
topology: tpu7x:2x2x1
jax: 0.10.0
libtpu: 0.0.40
codegen_flags: <defaults>
</compile_context>

<pallas_src>
import math
from functools import partial

import jax
import jax.numpy as jnp
from jax.experimental import pallas as pl
from jax.experimental.pallas import tpu as pltpu


def _round_up(x, m):
    return ((x + m - 1) // m) * m


def _arcface_kernel(labels_ref, logits_ref, out_ref, *, cos_m, sin_m, theta,
                    sinmm, scale):
    logits = logits_ref[...]                      # (tn, tc) f32
    labels = labels_ref[...]                      # (tn, 1)  i32

    # Global class index for every element of this tile: tile-local iota plus
    # the C-tile offset (class axis is grid axis 1).
    tc = logits.shape[1]
    col0 = pl.program_id(1) * tc
    col = jax.lax.broadcasted_iota(jnp.int32, logits.shape, dimension=1) + col0
    # Element (i, j) is the "target logit" iff j == labels[i] and labels[i] != -1.
    is_target = (col == labels) & (labels != jnp.int32(-1))

    t = logits
    # No clamp, mirroring torch.sqrt(1 - t^2) exactly (NaN if |t| > 1);
    # off-target lanes are discarded by the select below (forward-only).
    sin_theta = jnp.sqrt(1.0 - t * t)
    cos_theta_m = t * cos_m - sin_theta * sin_m
    final_target = jnp.where(t > theta, cos_theta_m, t - sinmm)

    out_ref[...] = jnp.where(is_target, final_target, t) * scale


def arcface_forward(logits, labels, *, s=64.0, margin=0.5,
                    block_rows=None, block_cols=None):
    """Pallas ArcFace forward. logits: (N, C) float, labels: (N,) int."""
    N, C = logits.shape
    logits = logits.astype(jnp.float32)
    labels2d = labels.reshape(N, 1).astype(jnp.int32)

    # ---- class tile: lane-dense (multiple of 128), capped at 2048 ----------
    c128 = _round_up(C, 128)
    if block_cols is None:
        block_cols = min(2048, c128)
    else:
        block_cols = min(_round_up(block_cols, 128), c128)
    C_pad = _round_up(C, block_cols)

    # ---- row tile: target ~4 MiB of f32 per buffer (fits every generation's
    # scoped VMEM with double-buffered in+out), multiple of 8 sublanes --------
    n8 = _round_up(N, 8)
    if block_rows is None:
        target_rows = max(8, (((4 << 20) // (block_cols * 4)) // 8) * 8)
        block_rows = min(target_rows, n8)
    else:
        block_rows = min(_round_up(block_rows, 8), n8)
    N_pad = _round_up(n8, block_rows)

    # ---- pad: extra rows get label=-1 (ignored), extra cols never match -----
    if (N_pad, C_pad) != (N, C):
        logits = jnp.pad(logits, ((0, N_pad - N), (0, C_pad - C)))
        labels2d = jnp.pad(labels2d, ((0, N_pad - N), (0, 0)),
                           constant_values=-1)

    kernel = partial(
        _arcface_kernel,
        cos_m=math.cos(margin),
        sin_m=math.sin(margin),
        theta=math.cos(math.pi - margin),
        sinmm=math.sin(math.pi - margin) * margin,
        scale=s,
    )

    out = pl.pallas_call(
        kernel,
        out_shape=jax.ShapeDtypeStruct((N_pad, C_pad), jnp.float32),
        grid=(N_pad // block_rows, C_pad // block_cols),
        in_specs=[
            pl.BlockSpec((block_rows, 1), lambda i, j: (i, 0)),           # labels
            pl.BlockSpec((block_rows, block_cols), lambda i, j: (i, j)),  # logits
        ],
        out_specs=pl.BlockSpec((block_rows, block_cols), lambda i, j: (i, j)),
        input_output_aliases={1: 0},   # update the (padded) logits in place
        compiler_params=pltpu.CompilerParams(
            dimension_semantics=("parallel", "parallel"),
            vmem_limit_bytes=32 * 1024 * 1024),
    )(labels2d, logits)

    if (N_pad, C_pad) != (N, C):
        out = out[:N, :C]
    return out


def arcface_reference(logits, labels, *, s=64.0, margin=0.5):
    """Pure-JAX reference mirroring the PyTorch module."""
    cos_m = math.cos(margin)
    sin_m = math.sin(margin)
    theta = math.cos(math.pi - margin)
    sinmm = math.sin(math.pi - margin) * margin

    _, C = logits.shape
    col = jnp.arange(C, dtype=jnp.int32)[None, :]
    lab = labels.astype(jnp.int32)[:, None]
    is_target = (col == lab) & (lab != -1)

    t = logits.astype(jnp.float32)
    sin_theta = jnp.sqrt(1.0 - t * t)
    cos_theta_m = t * cos_m - sin_theta * sin_m
    final_target = jnp.where(t > theta, cos_theta_m, t - sinmm)
    return jnp.where(is_target, final_target, t) * s


if __name__ == "__main__":
    key = jax.random.PRNGKey(0)

    # Case 1: small aligned problem, single tile (default tile selection).
    N, C = 8, 128
    k_log, k_lab, key = jax.random.split(key, 3)
    logits = jax.random.uniform(k_log, (N, C), dtype=jnp.float32,
                                minval=-0.99, maxval=0.99)
    labels = jax.random.randint(k_lab, (N,), 0, C, dtype=jnp.int32)
    labels = labels.at[1].set(-1).at[5].set(-1)          # "ignore" rows

    out = jax.block_until_ready(arcface_forward(logits, labels))
    ref = arcface_reference(logits, labels)
    assert out.shape == (N, C) and out.dtype == jnp.float32
    assert jnp.allclose(out, ref, atol=1e-5, rtol=1e-5), "case1 mismatch"

    # Case 2: ragged N, multi-tile class axis (exercises row padding and the
    # global column offset for C-tiling).
    N2, C2 = 10, 384
    k_log2, k_lab2, key = jax.random.split(key, 3)
    logits2 = jax.random.uniform(k_log2, (N2, C2), dtype=jnp.float32,
                                 minval=-0.99, maxval=0.99)
    labels2 = jax.random.randint(k_lab2, (N2,), 0, C2, dtype=jnp.int32)
    labels2 = labels2.at[3].set(-1)

    out2 = jax.block_until_ready(
        arcface_forward(logits2, labels2, block_rows=8, block_cols=128))
    ref2 = arcface_reference(logits2, labels2)
    assert out2.shape == (N2, C2)
    assert jnp.allclose(out2, ref2, atol=1e-5, rtol=1e-5), "case2 mismatch"

    print("KERNEL_OK")
</pallas_src>

<mosaic_0001>
module attributes {stable_mosaic.version = 11 : i64} {
  func.func @_arcface_kernel(%arg0: i32, %arg1: i32, %arg2: memref<8x1xi32, #tpu.memory_space<vmem>>, %arg3: memref<8x128xf32, #tpu.memory_space<vmem>>, %arg4: memref<8x128xf32, #tpu.memory_space<vmem>>) attributes {dimension_semantics = [#tpu.dimension_semantics<parallel>, #tpu.dimension_semantics<parallel>], iteration_bounds = array<i64: 1, 1>, scalar_prefetch = 0 : i64, scratch_operands = 0 : i64, tpu.core_type = #tpu.core_type<tc>, window_params = [{transform_indices = @transform_0, window_bounds = array<i64: 8, 1>}, {transform_indices = @transform_1, window_bounds = array<i64: 8, 128>}, {transform_indices = @transform_2, window_bounds = array<i64: 8, 128>}]} {
    %c0 = arith.constant 0 : index
    %c0_0 = arith.constant 0 : index
    %0 = vector.load %arg3[%c0, %c0_0] : memref<8x128xf32, #tpu.memory_space<vmem>>, vector<8x128xf32>
    %c0_1 = arith.constant 0 : index
    %c0_2 = arith.constant 0 : index
    %1 = vector.load %arg2[%c0_1, %c0_2] : memref<8x1xi32, #tpu.memory_space<vmem>>, vector<8x1xi32>
    %c128_i32 = arith.constant 128 : i32
    %2 = arith.muli %arg1, %c128_i32 : i32
    %3 = tpu.iota {dimensions = array<i32: 1>} : vector<8x128xi32>
    %4 = vector.broadcast %2 : i32 to vector<8x128xi32>
    %5 = arith.addi %3, %4 : vector<8x128xi32>
    %6 = vector.broadcast %1 : vector<8x1xi32> to vector<8x128xi32>
    %7 = arith.cmpi eq, %5, %6 : vector<8x128xi32>
    %c-1_i32 = arith.constant -1 : i32
    %8 = vector.broadcast %c-1_i32 : i32 to vector<8x1xi32>
    %9 = arith.cmpi ne, %1, %8 : vector<8x1xi32>
    %10 = vector.broadcast %9 : vector<8x1xi1> to vector<8x128xi1>
    %11 = arith.andi %7, %10 : vector<8x128xi1>
    %12 = arith.mulf %0, %0 : vector<8x128xf32>
    %cst = arith.constant 1.000000e+00 : f32
    %13 = vector.broadcast %cst : f32 to vector<8x128xf32>
    %14 = arith.subf %13, %12 : vector<8x128xf32>
    %15 = math.sqrt %14 : vector<8x128xf32>
    %cst_3 = arith.constant 0.87758255 : f32
    %16 = vector.broadcast %cst_3 : f32 to vector<8x128xf32>
    %17 = arith.mulf %0, %16 : vector<8x128xf32>
    %cst_4 = arith.constant 0.47942555 : f32
    %18 = vector.broadcast %cst_4 : f32 to vector<8x128xf32>
    %19 = arith.mulf %15, %18 : vector<8x128xf32>
    %20 = arith.subf %17, %19 : vector<8x128xf32>
    %cst_5 = arith.constant -0.87758255 : f32
    %21 = vector.broadcast %cst_5 : f32 to vector<8x128xf32>
    %22 = arith.cmpf ogt, %0, %21 : vector<8x128xf32>
    %cst_6 = arith.constant 0.239712775 : f32
    %23 = vector.broadcast %cst_6 : f32 to vector<8x128xf32>
    %24 = arith.subf %0, %23 : vector<8x128xf32>
    %25 = arith.select %22, %20, %24 : vector<8x128xi1>, vector<8x128xf32>
    %26 = arith.select %11, %25, %0 : vector<8x128xi1>, vector<8x128xf32>
    %cst_7 = arith.constant 6.400000e+01 : f32
    %27 = vector.broadcast %cst_7 : f32 to vector<8x128xf32>
    %28 = arith.mulf %26, %27 : vector<8x128xf32>
    %c0_8 = arith.constant 0 : index
    %c0_9 = arith.constant 0 : index
    %29 = vector.load %arg4[%c0_8, %c0_9] : memref<8x128xf32, #tpu.memory_space<vmem>>, vector<8x128xf32>
    tpu.vector_store %arg4[%c0_8, %c0_9], %28 {strides = array<i32>} : memref<8x128xf32, #tpu.memory_space<vmem>>, vector<8x128xf32>,
    return
  }
  func.func @transform_0(%arg0: i32, %arg1: i32) -> (i32, i32) {
    %c0_i32 = arith.constant 0 : i32
    %c0_i32_0 = arith.constant 0 : i32
    return %arg0, %c0_i32 : i32, i32
  }
  func.func @transform_1(%arg0: i32, %arg1: i32) -> (i32, i32) {
    %c0_i32 = arith.constant 0 : i32
    return %arg0, %arg1 : i32, i32
  }
  func.func @transform_2(%arg0: i32, %arg1: i32) -> (i32, i32) {
    %c0_i32 = arith.constant 0 : i32
    return %arg0, %arg1 : i32, i32
  }
}

</mosaic_0001>

<bundles_post_ra>
// kernel: tpu_custom_call.1
= control target key start
LH: loop header
LB: loop body
LE: loop exit
PB: predicated region body
PF: predicated region fallthrough
CT: control target
= control target key end

     0   :  { %7 = vsyncpa [#allocation3], 0  ;;  %s175_s0 = inlined_call_operand.vmem [shape: s32[8,1], index: 0, kind: input, shape index: {}]   ;;  %s176_s1 = inlined_call_operand.hbm [shape: f32[8,128], index: 1, kind: input, shape index: {}, may-alias: {1,2}]   ;;  %s177_s2 = inlined_call_operand.hbm [shape: f32[8,128], index: 2, kind: output, shape index: {}, may-alias: {1,2}]  }
   0x1   :  { %8 = vsyncpa [#allocation4], 0  ;;  %s130_s9 = smov [#allocation2]   ;;  %s82_s13 = scalar_lea.hbm %s176_s1, 128 }
   0x2   :  { %s17_s10 = sshll.u32 %s130_s9, 4  ;;  %p83_p0 = scmp.ne.s32.totalorder %s176_s1, %s82_s13  ;;  %s18_s10 = int_to_ptr.vmem [resolvable:$true] %s17_s10 }
   0x3   :  { %p86_p1 = scmp.lt.u32.totalorder %s82_s13, %s176_s1 }
   0x5   :  { %p88_p2 = pnand %p86_p1, %p83_p0 }
   0x7   :  { %91 = shalt.err (!%p88_p2)
}
   0x8   :  { %s92_s18 = scalar_lea.vmem %s18_s10, 128  ;;  %p97_p4 = scmp.lt.s32.totalorder %s18_s10, %s18_s10 }
   0x9   :  { %p93_p3 = scmp.ne.s32.totalorder %s18_s10, %s92_s18  ;;  %p98_p5 = scmp.lt.s32.totalorder %s92_s18, %s92_s18 }
   0xb   :  { %p99_p6 = por %p98_p5, %p97_p4 }
   0xd   :  { %p100_p7 = pnand %p99_p6, %p93_p3 }
   0xf   :  { %103 = shalt.err (!%p100_p7)
}
  0x10   :  { %20 = dma.hbm_to_vmem [thread:$0]  %s176_s1, 128, %s18_s10, [#allocation3]  }
  0x11   :  { %126 = dma.done.wait [#allocation3], 128  }
  0x12   :  { %127 = vsyncadd [#allocation3], 4294967168  ;;  %v131_v0 = vmov 0   ;;  %v25_v1 = vld [vmem:[%s175_s0] sm:$0xff]  ;;  %v27_v13 = vlaneseq  ;;  %s132_s0 = smov [#allocation5]  }
  0x13   :  { %79 = vset.pattern.permute.xlu0 %v131_v0  ;;  %vm35_vm0 = vcmp.ne.s32.totalorder %v25_v1, 4294967295  ;;  %v24_v3 = vld [vmem:[#allocation2] sm:$0xff]  ;;  %s66_s1 = sshll.u32 %s132_s0, 4  ;;  %s67_s1 = int_to_ptr.vmem [resolvable:$true] %s66_s1 }
  0x14   :  { %32 = vperm.xlu0 %79, %v25_v1   ;;  %v36_v2 = vsel %vm35_vm0, 1, %v131_v0  ;;  %v42_v4 = vmul.f32 %v24_v3, %v24_v3  ;;  %v51_v11 = vmul.f32 0.87758255, %v24_v3  ;;  %v75_v16 = vadd.f32 -0.23971277, %v24_v3  ;;  %s104_s23 = scalar_lea.vmem %s67_s1, 128  ;;  %p109_p9 = scmp.lt.s32.totalorder %s67_s1, %s67_s1 }
  0x15   :  { %v28_v17 = vand.u32 127, %v27_v13  ;;  %vm54_vm3 = vcmp.gt.f32.partialorder %v24_v3, -0.87758255  ;;  %p105_p8 = scmp.ne.s32.totalorder %s67_s1, %s104_s23  ;;  %p110_p10 = scmp.lt.s32.totalorder %s104_s23, %s104_s23 }
  0x16   :  { %v43_v5 = vsub.f32 1.0, %v42_v4 }
  0x17   :  { %p111_p11 = por %p110_p10, %p109_p9 }
  0x18   :  { %38 = vperm.xlu0 %79, %v36_v2   ;;  %80 = vrsqrt.f32 %v43_v5  ;;  %vm46_vm1 = vcmp.eq.f32.partialorder %v43_v5, inf  ;;  %v49_v8 = vand.u32 2147483648, %v43_v5  ;;  %vm48_vm2 = vcmp.eq.f32.partialorder %v43_v5, 0.0 }
  0x19   :  { %p112_p12 = pnand %p111_p11, %p105_p8 }
  0x22   :  { %v81_v6 = vpop.eup %80 }
  0x23   :  { %v45_v7 = vmul.f32 %v81_v6, %v43_v5 }
  0x25   :  { %v47_v9 = vsel %vm46_vm1, %v43_v5, %v45_v7 }
  0x26   :  { %v50_v10 = vsel %vm48_vm2, %v49_v8, %v47_v9 }
  0x27   :  { %v52_v12 = vmul.f32 0.47942555, %v50_v10 }
  0x29   :  { %v53_v15 = vsub.f32 %v51_v11, %v52_v12 }
  0x2b   :  { %v56_v19 = vsel %vm54_vm3, %v53_v15, %v75_v16 }
  0x93   :  { %v33_v14 = vpop.permute.xlu0 %32 }
  0x94   :  { %vm34_vm4 = vcmp.eq.s32.totalorder %v28_v17, %v33_v14 }
  0x97   :  { %v39_v18 = vpop.permute.xlu0 %38 }
  0x98   :  { %vm40_vm5 = vcmp.eq.s32.totalorder %v39_v18, 1 }
  0x99   :  { %vm41_vm6 = vmand %vm34_vm4, %vm40_vm5 }
  0x9a   :  { %v57_v20 = vsel %vm41_vm6, %v56_v19, %v24_v3 }
  0x9b   :  { %v58_v21 = vmul.f32 64.0, %v57_v20 }
  0x9d   :  { %59 = vst [vmem:[#allocation5] sm:$0xff] %v58_v21 }
  0x9e   :  { %115 = shalt.err (!%p112_p12)
}
  0x9f   :  { %s116_s26 = scalar_lea.hbm %s177_s2, 128 }
  0xa0   :  { %p117_p13 = scmp.ne.s32.totalorder %s177_s2, %s116_s26  ;;  %p120_p0 = scmp.lt.u32.totalorder %s116_s26, %s177_s2 }
  0xa2   :  { %p122_p1 = pnand %p120_p0, %p117_p13 }
  0xa4   :  { %125 = shalt.err (!%p122_p1)
}
  0xa5   :  { %69 = dma.vmem_to_hbm [thread:$0]  %s67_s1, 128, %s177_s2, [#allocation4]  }
  0xa6   :  { %128 = dma.done.wait [#allocation4], 128  }
  0xa7   :  { %129 = vsyncadd [#allocation4], 4294967168 }
  0xa8   :  { %73 = vsyncpa [#allocation3], 1 }
  0xa9   :  { %74 = vsyncpa [#allocation4], 1 }

</bundles_post_ra>
